<compile_context>
chip_gen: v6e
topology: v6e:2x2x1
jax: 0.10.0
libtpu: 0.0.40
codegen_flags: <defaults>
</compile_context>

<pallas_src>
import functools

import jax
import jax.numpy as jnp
from jax.experimental import pallas as pl
from jax.experimental.pallas import tpu as pltpu


def prediction_head_kernel(x_ref, w1_ref, b1_ref, w2_ref, b2_ref, o_ref):
    """One batch tile: relu(x @ W1 + b1) @ W2 + b2, entirely in VMEM.

    x/W1/W2 arrive in bf16; both matmuls accumulate in f32 on the MXU and the
    biases are added in f32.
    """
    x = x_ref[...]  # (block_b, d_in) bf16

    # fc1 (MXU, f32 accumulate) + f32 bias + ReLU (VPU).
    h = jnp.dot(x, w1_ref[...], preferred_element_type=jnp.float32)
    h = jnp.maximum(h + b1_ref[...], 0.0)

    # fc2 (MXU, f32 accumulate) + f32 bias.
    y = jnp.dot(h.astype(w2_ref.dtype), w2_ref[...],
                preferred_element_type=jnp.float32)
    y = y + b2_ref[...]

    o_ref[...] = y.astype(o_ref.dtype)


def _round_up(n, m):
    return ((n + m - 1) // m) * m


@functools.partial(jax.jit, static_argnames=("block_b",))
def prediction_head_forward(x, w1, b1, w2, b2, *, block_b=None):
    """x: (B, D_proj) f32 -> (B, D_proj) f32.

    w1: (D_proj, D_pred), b1: (1, D_pred), w2: (D_pred, D_proj), b2: (1, D_proj)
    (weights already transposed to (in_features, out_features)).
    """
    B, d_in = x.shape
    d_hid = w1.shape[1]
    d_out = w2.shape[1]

    # Batch tile: multiple of 8 sublanes, capped at 256 (v6e/v7x MXU rows).
    # For small B this is a single full-batch tile -> grid=(1,), no padding.
    if block_b is None:
        block_b = min(256, _round_up(B, 8))
    block_b = max(8, _round_up(block_b, 8))

    b_pad = _round_up(B, block_b)
    if b_pad != B:
        x = jnp.pad(x, ((0, b_pad - B), (0, 0)))

    # bf16 weights/activations (half the DMA bytes, native MXU rate); f32 biases.
    x_bf = x.astype(jnp.bfloat16)
    w1_bf = w1.astype(jnp.bfloat16)
    w2_bf = w2.astype(jnp.bfloat16)
    b1_f32 = b1.astype(jnp.float32)
    b2_f32 = b2.astype(jnp.float32)

    grid = (b_pad // block_b,)

    # Explicit VMEM budget: single-buffered resident weights + double-buffered
    # x / out tiles + f32 intermediate h, with 2x headroom, floored at 8 MiB
    # (internal scratch) and capped at v7x's 64 MiB physical VMEM.
    weight_bytes = (d_in * d_hid + d_hid * d_out) * 2          # bf16 W1, W2
    weight_bytes += 8 * (d_hid + d_out) * 4                     # biases (8-sublane pad)
    io_bytes = 2 * (block_b * d_in * 2 + block_b * d_out * 4)   # double-buffered x, out
    h_bytes = block_b * d_hid * 4
    vmem_limit = int(min(64 * 1024 * 1024,
                         max(2 * (weight_bytes + io_bytes + h_bytes),
                             8 * 1024 * 1024)))

    flops = 2 * b_pad * (d_in * d_hid + d_hid * d_out)
    bytes_accessed = (b_pad * d_in * 2                     # x (bf16)
                      + (d_in * d_hid + d_hid * d_out) * 2  # W1, W2 (bf16)
                      + (d_hid + d_out) * 4                 # biases (f32)
                      + b_pad * d_out * 4)                  # out (f32)

    out = pl.pallas_call(
        prediction_head_kernel,
        out_shape=jax.ShapeDtypeStruct((b_pad, d_out), jnp.float32),
        grid=grid,
        in_specs=[
            # Activations: one batch tile per grid step (double-buffered).
            pl.BlockSpec((block_b, d_in), lambda i: (i, 0)),
            # Weights / biases: constant block index -> DMA'd once and kept
            # VMEM-resident; single-buffered since the block never changes.
            pl.BlockSpec((d_in, d_hid), lambda i: (0, 0),
                         pipeline_mode=pl.Buffered(1)),
            pl.BlockSpec((1, d_hid), lambda i: (0, 0),
                         pipeline_mode=pl.Buffered(1)),
            pl.BlockSpec((d_hid, d_out), lambda i: (0, 0),
                         pipeline_mode=pl.Buffered(1)),
            pl.BlockSpec((1, d_out), lambda i: (0, 0),
                         pipeline_mode=pl.Buffered(1)),
        ],
        out_specs=pl.BlockSpec((block_b, d_out), lambda i: (i, 0)),
        compiler_params=pltpu.CompilerParams(
            # Batch tiles are independent -> shard across TensorCores on v7x.
            dimension_semantics=("parallel",),
            vmem_limit_bytes=vmem_limit,
        ),
        cost_estimate=pl.CostEstimate(
            flops=flops,
            transcendentals=0,
            bytes_accessed=int(bytes_accessed),
        ),
    )(x_bf, w1_bf, b1_f32, w2_bf, b2_f32)

    if b_pad != B:
        out = out[:B]
    return out


def init_params(key, projection_out_dim, prediction_dim):
    """PyTorch nn.Linear-style uniform init; weights stored transposed (in, out)."""
    ks = jax.random.split(key, 4)

    def u(k, shape, bound):
        return jax.random.uniform(k, shape, jnp.float32, -bound, bound)

    bound1 = 1.0 / jnp.sqrt(projection_out_dim)  # fc1 fan-in
    bound2 = 1.0 / jnp.sqrt(prediction_dim)      # fc2 fan-in
    return {
        "w1": u(ks[0], (projection_out_dim, prediction_dim), bound1),
        "b1": u(ks[1], (1, prediction_dim), bound1),
        "w2": u(ks[2], (prediction_dim, projection_out_dim), bound2),
        "b2": u(ks[3], (1, projection_out_dim), bound2),
    }


def reference_forward(x, p):
    """Pure-JAX f32 reference of the PyTorch forward for a correctness check."""
    h = jnp.maximum(x @ p["w1"] + p["b1"], 0.0)
    return h @ p["w2"] + p["b2"]


if __name__ == "__main__":
    key = jax.random.PRNGKey(0)

    # Small shapes consistent with the module:
    #   args.projection_out_dim = 128, args.prediction_dim = 256, batch = 16.
    B, D_PROJ, D_PRED = 16, 128, 256

    k_x, k_p = jax.random.split(key, 2)
    x = jax.random.normal(k_x, (B, D_PROJ), jnp.float32)
    params = init_params(k_p, D_PROJ, D_PRED)

    # Default block_b -> single full-batch tile, grid=(1,), no pad/slice.
    out = prediction_head_forward(
        x, params["w1"], params["b1"], params["w2"], params["b2"]
    )
    out = jax.block_until_ready(out)

    ref = reference_forward(x, params)
    assert out.shape == (B, D_PROJ)
    # bf16 inputs with f32 accumulation vs. pure-f32 reference: loose tolerance.
    assert jnp.allclose(out, ref, atol=5e-2, rtol=5e-2), float(
        jnp.max(jnp.abs(out - ref))
    )

    print("KERNEL_OK")
</pallas_src>

<mosaic_0001>
module attributes {stable_mosaic.version = 11 : i64} {
  func.func @prediction_head_kernel(%arg0: i32, %arg1: memref<16x128xbf16, #tpu.memory_space<vmem>>, %arg2: memref<128x256xbf16, #tpu.memory_space<vmem>>, %arg3: memref<1x256xf32, #tpu.memory_space<vmem>>, %arg4: memref<256x128xbf16, #tpu.memory_space<vmem>>, %arg5: memref<1x128xf32, #tpu.memory_space<vmem>>, %arg6: memref<16x128xf32, #tpu.memory_space<vmem>>) attributes {dimension_semantics = [#tpu.dimension_semantics<parallel>], iteration_bounds = array<i64: 1>, scalar_prefetch = 0 : i64, scratch_operands = 0 : i64, tpu.core_type = #tpu.core_type<tc>, window_params = [{transform_indices = @transform_0, window_bounds = array<i64: 16, 128>}, {pipeline_mode = #tpu.pipeline_mode<synchronous>, transform_indices = @transform_1, window_bounds = array<i64: 128, 256>}, {pipeline_mode = #tpu.pipeline_mode<synchronous>, transform_indices = @transform_2, window_bounds = array<i64: 1, 256>}, {pipeline_mode = #tpu.pipeline_mode<synchronous>, transform_indices = @transform_3, window_bounds = array<i64: 256, 128>}, {pipeline_mode = #tpu.pipeline_mode<synchronous>, transform_indices = @transform_4, window_bounds = array<i64: 1, 128>}, {transform_indices = @transform_5, window_bounds = array<i64: 16, 128>}]} {
    %c0 = arith.constant 0 : index
    %c0_0 = arith.constant 0 : index
    %0 = vector.load %arg1[%c0, %c0_0] : memref<16x128xbf16, #tpu.memory_space<vmem>>, vector<16x128xbf16>
    %c0_1 = arith.constant 0 : index
    %c0_2 = arith.constant 0 : index
    %1 = vector.load %arg2[%c0_1, %c0_2] : memref<128x256xbf16, #tpu.memory_space<vmem>>, vector<128x256xbf16>
    %cst = arith.constant dense<0.000000e+00> : vector<16x256xf32>
    %2 = tpu.matmul %0, %1, %cst {dimension_numbers = #tpu.dot_dimension_numbers<[1], [0], [0], [1], [0, 0, 1, 1], [], []>} : vector<16x128xbf16>, vector<128x256xbf16>, vector<16x256xf32> -> vector<16x256xf32>
    %c0_3 = arith.constant 0 : index
    %c0_4 = arith.constant 0 : index
    %3 = vector.load %arg3[%c0_3, %c0_4] : memref<1x256xf32, #tpu.memory_space<vmem>>, vector<1x256xf32>
    %4 = vector.broadcast %3 : vector<1x256xf32> to vector<16x256xf32>
    %5 = arith.addf %2, %4 : vector<16x256xf32>
    %cst_5 = arith.constant 0.000000e+00 : f32
    %6 = vector.broadcast %cst_5 : f32 to vector<16x256xf32>
    %7 = arith.maximumf %5, %6 : vector<16x256xf32>
    %8 = arith.truncf %7 : vector<16x256xf32> to vector<16x256xbf16>
    %c0_6 = arith.constant 0 : index
    %c0_7 = arith.constant 0 : index
    %9 = vector.load %arg4[%c0_6, %c0_7] : memref<256x128xbf16, #tpu.memory_space<vmem>>, vector<256x128xbf16>
    %cst_8 = arith.constant dense<0.000000e+00> : vector<16x128xf32>
    %10 = tpu.matmul %8, %9, %cst_8 {dimension_numbers = #tpu.dot_dimension_numbers<[1], [0], [0], [1], [0, 0, 1, 1], [], []>} : vector<16x256xbf16>, vector<256x128xbf16>, vector<16x128xf32> -> vector<16x128xf32>
    %c0_9 = arith.constant 0 : index
    %c0_10 = arith.constant 0 : index
    %11 = vector.load %arg5[%c0_9, %c0_10] : memref<1x128xf32, #tpu.memory_space<vmem>>, vector<1x128xf32>
    %12 = vector.broadcast %11 : vector<1x128xf32> to vector<16x128xf32>
    %13 = arith.addf %10, %12 : vector<16x128xf32>
    %c0_11 = arith.constant 0 : index
    %c0_12 = arith.constant 0 : index
    %14 = vector.load %arg6[%c0_11, %c0_12] : memref<16x128xf32, #tpu.memory_space<vmem>>, vector<16x128xf32>
    tpu.vector_store %arg6[%c0_11, %c0_12], %13 {strides = array<i32>} : memref<16x128xf32, #tpu.memory_space<vmem>>, vector<16x128xf32>,
    return
  }
  func.func @transform_0(%arg0: i32) -> (i32, i32) {
    %c0_i32 = arith.constant 0 : i32
    %c0_i32_0 = arith.constant 0 : i32
    return %arg0, %c0_i32 : i32, i32
  }
  func.func @transform_1(%arg0: i32) -> (i32, i32) {
    %c0_i32 = arith.constant 0 : i32
    %c0_i32_0 = arith.constant 0 : i32
    %c0_i32_1 = arith.constant 0 : i32
    return %c0_i32, %c0_i32_0 : i32, i32
  }
  func.func @transform_2(%arg0: i32) -> (i32, i32) {
    %c0_i32 = arith.constant 0 : i32
    %c0_i32_0 = arith.constant 0 : i32
    %c0_i32_1 = arith.constant 0 : i32
    return %c0_i32, %c0_i32_0 : i32, i32
  }
  func.func @transform_3(%arg0: i32) -> (i32, i32) {
    %c0_i32 = arith.constant 0 : i32
    %c0_i32_0 = arith.constant 0 : i32
    %c0_i32_1 = arith.constant 0 : i32
    return %c0_i32, %c0_i32_0 : i32, i32
  }
  func.func @transform_4(%arg0: i32) -> (i32, i32) {
    %c0_i32 = arith.constant 0 : i32
    %c0_i32_0 = arith.constant 0 : i32
    %c0_i32_1 = arith.constant 0 : i32
    return %c0_i32, %c0_i32_0 : i32, i32
  }
  func.func @transform_5(%arg0: i32) -> (i32, i32) {
    %c0_i32 = arith.constant 0 : i32
    %c0_i32_0 = arith.constant 0 : i32
    return %arg0, %c0_i32 : i32, i32
  }
}

</mosaic_0001>

<bundles_post_ra>
// kernel: prediction_head_forward.1
= control target key start
LH: loop header
LB: loop body
LE: loop exit
PB: predicated region body
PF: predicated region fallthrough
CT: control target
= control target key end

     0   :  { %v504_v2 = vmov 0   ;;  %s646_s0 = inlined_call_operand.vmem [shape: bf16[16,128], index: 0, kind: input, shape index: {}]   ;;  %s647_s1 = inlined_call_operand.vmem [shape: bf16[128,256], index: 1, kind: input, shape index: {}]   ;;  %s648_s2 = inlined_call_operand.vmem [shape: f32[1,256], index: 2, kind: input, shape index: {}]   ;;  %s649_s3 = inlined_call_operand.vmem [shape: bf16[256,128], index: 3, kind: input, shape index: {}]   ;;  %s650_s4 = inlined_call_operand.vmem [shape: f32[1,128], index: 4, kind: input, shape index: {}]   ;;  %s651_s5 = inlined_call_operand.hbm [shape: f32[16,128], index: 5, kind: output, shape index: {}]  }
   0x1   :  { %v441_v0 = vld [vmem:[%s647_s1 + $0x74] ss:$8 sps:$4 sm:$0xff]   ;;  %v443_v1 = vld [vmem:[%s647_s1 + $0x70] ss:$8 sps:$4 sm:$0xff]   ;;  %170 = vmatprep.mubr.bf16.mxu0 %v504_v2  ;;  %v444_v3 = vld [vmem:[%s647_s1 + $0x64] ss:$8 sps:$4 sm:$0xff]  }
   0x2   :  { %138 = vmatprep.subr.bf16.mxu0 %v441_v0  ;;  %v446_v4 = vld [vmem:[%s647_s1 + $0x60] ss:$8 sps:$4 sm:$0xff]   ;;  %v447_v5 = vld [vmem:[%s647_s1 + $0x54] ss:$8 sps:$4 sm:$0xff]   ;;  %v449_v6 = vld [vmem:[%s647_s1 + $0x50] ss:$8 sps:$4 sm:$0xff]  }
   0x3   :  { %139 = vmatpush1.bf16.msra.mxu0 %v443_v1  ;;  %v450_v7 = vld [vmem:[%s647_s1 + $0x44] ss:$8 sps:$4 sm:$0xff]   ;;  %v452_v8 = vld [vmem:[%s647_s1 + $0x40] ss:$8 sps:$4 sm:$0xff]   ;;  %v453_v9 = vld [vmem:[%s647_s1 + $0x34] ss:$8 sps:$4 sm:$0xff]  }
   0x4   :  { %140 = vmatprep.subr.bf16.mxu0 %v444_v3  ;;  %v466_v10 = vld [vmem:[%s649_s3 + $0x78] sm:$0xff]   ;;  %v456_v13 = vld [vmem:[%s647_s1 + $0x24] ss:$8 sps:$4 sm:$0xff]   ;;  %v468_v14 = vld [vmem:[%s649_s3 + $0x70] sm:$0xff]  }
   0x5   :  { %v455_v11 = vld [vmem:[%s647_s1 + $0x30] ss:$8 sps:$4 sm:$0xff]   ;;  %415 = vmatprep.subr.bf16.mxu1 %v466_v10  ;;  %v470_v16 = vld [vmem:[%s649_s3 + $0x68] sm:$0xff]   ;;  %v459_v18 = vld [vmem:[%s647_s1 + $0x14] ss:$8 sps:$4 sm:$0xff]  }
   0x6   :  { %v467_v12 = vld [vmem:[%s649_s3 + $0x38] sm:$0xff]   ;;  %v469_v15 = vld [vmem:[%s649_s3 + $0x30] sm:$0xff]   ;;  %v458_v17 = vld [vmem:[%s647_s1 + $0x20] ss:$8 sps:$4 sm:$0xff]  }
   0x7   :  { %141 = vmatpush1.bf16.msra.mxu0 %v446_v4  ;;  %416 = vmatpush3.bf16.msra.mxu1 %v467_v12  ;;  %v471_v19 = vld [vmem:[%s649_s3 + $0x28] sm:$0xff]   ;;  %v472_v20 = vld [vmem:[%s649_s3 + $0x60] sm:$0xff]   ;;  %v461_v21 = vld [vmem:[%s647_s1 + $0x10] ss:$8 sps:$4 sm:$0xff]  }
   0x8   :  { %142 = vmatprep.subr.bf16.mxu0 %v447_v5  ;;  %417 = vmatprep.subr.bf16.mxu1 %v468_v14  ;;  %v473_v22 = vld [vmem:[%s649_s3 + $0x20] sm:$0xff]   ;;  %v474_v24 = vld [vmem:[%s649_s3 + $0x58] sm:$0xff]  }
   0x9   :  { %v462_v23 = vld [vmem:[%s647_s1 + $0x4] ss:$8 sps:$4 sm:$0xff]  }
   0xb   :  { %143 = vmatpush1.bf16.msra.mxu0 %v449_v6  ;;  %418 = vmatpush3.bf16.msra.mxu1 %v469_v15 }
   0xc   :  { %144 = vmatprep.subr.bf16.mxu0 %v450_v7  ;;  %419 = vmatprep.subr.bf16.mxu1 %v470_v16 }
   0xf   :  { %145 = vmatpush1.bf16.msra.mxu0 %v452_v8  ;;  %420 = vmatpush3.bf16.msra.mxu1 %v471_v19 }
  0x10   :  { %146 = vmatprep.subr.bf16.mxu0 %v453_v9  ;;  %421 = vmatprep.subr.bf16.mxu1 %v472_v20 }
  0x13   :  { %147 = vmatpush1.bf16.msra.mxu0 %v455_v11 }
  0x14   :  { %148 = vmatprep.subr.bf16.mxu0 %v456_v13 }
  0x17   :  { %149 = vmatpush1.bf16.msra.mxu0 %v458_v17 }
  0x18   :  { %150 = vmatprep.subr.bf16.mxu0 %v459_v18 }
  0x19   :  { %10 = vsyncpa [#allocation3], 0  ;;  %v464_v25 = vld [vmem:[%s647_s1] ss:$8 sps:$4 sm:$0xff]   ;;  %422 = vmatpush3.bf16.msra.mxu1 %v473_v22  ;;  %v475_v26 = vld [vmem:[%s649_s3 + $0x18] sm:$0xff]   ;;  %v42_v34 = vlaneseq  ;;  %s505_s9 = smov [#allocation2]  }
  0x1a   :  { %423 = vmatprep.subr.bf16.mxu1 %v474_v24  ;;  %v465_v27 = vld [vmem:[%s646_s0] sm:$0xff]   ;;  %v476_v28 = vld [vmem:[%s649_s3 + $0x50] sm:$0xff]   ;;  %v478_v30 = vld [vmem:[%s649_s3 + $0x48] sm:$0xff]   ;;  %s370_s10 = sshll.u32 %s505_s9, 4  ;;  %s371_s10 = int_to_ptr.vmem [resolvable:$true] %s370_s10 }
  0x1b   :  { %151 = vmatpush1.bf16.msra.mxu0 %v461_v21  ;;  %v477_v29 = vld [vmem:[%s649_s3 + $0x10] sm:$0xff]   ;;  %v479_v31 = vld [vmem:[%s649_s3 + $0x8] sm:$0xff]   ;;  %v480_v32 = vld [vmem:[%s649_s3 + $0x40] sm:$0xff]   ;;  %v43_v35 = vshrl.u32 %v42_v34, 7  ;;  %s482_s11 = scalar_lea.vmem %s371_s10, 256  ;;  %p487_p1 = scmp.lt.s32.totalorder %s371_s10, %s371_s10 }
  0x1c   :  { %152 = vmatprep.subr.bf16.mxu0 %v462_v23  ;;  %v481_v33 = vld [vmem:[%s649_s3] sm:$0xff]   ;;  %p483_p0 = scmp.ne.s32.totalorder %s371_s10, %s482_s11  ;;  %p488_p2 = scmp.lt.s32.totalorder %s482_s11, %s482_s11 }
  0x1d   :  { %424 = vmatpush3.bf16.msra.mxu1 %v475_v26  ;;  %v48_v36 = vsub.s32 1, %v43_v35  ;;  %v44_v37 = vsub.s32 0, %v43_v35  ;;  %v40_v38 = vld [vmem:[%s648_s2] sm:$0x3] }
  0x1e   :  { %425 = vmatprep.subr.bf16.mxu1 %v476_v28  ;;  %v398_v56 = vld [vmem:[%s650_s4] ss:$0 sm:$0xff]  ;;  %p489_p3 = por %p488_p2, %p487_p1 }
  0x1f   :  { %153 = vmatpush1.bf16.msra.mxu0 %v464_v25  ;;  %v49_v40 = vrot.slane %v40_v38, %v48_v36  ;;  %v45_v41 = vrot.slane %v40_v38, %v44_v37 }
  0x20   :  { %p490_p4 = pnand %p489_p3, %p483_p0 }
  0x21   :  { %426 = vmatpush3.bf16.msra.mxu1 %v477_v29 }
  0x22   :  { %171 = vmatmul.mubr.bf16.vlgmr.msra.gmra.mxu0 %v465_v27  ;;  %427 = vmatprep.subr.bf16.mxu1 %v478_v30 }
  0x25   :  { %428 = vmatpush3.bf16.msra.mxu1 %v479_v31 }
  0x26   :  { %429 = vmatprep.subr.bf16.mxu1 %v480_v32 }
  0x29   :  { %430 = vmatpush3.bf16.msra.mxu1 %v481_v33 }
  0xe2   :  { %v172_v39 = vpop.f32.mrf.mxu0 }
  0xe3   :  { %v173_v46 = vadd.f32 %v172_v39, %v45_v41 }
  0xe4   :  { %v174_v42 = vpop.f32.mrf.mxu0 }
  0xe5   :  { %v175_v44 = vadd.f32 %v174_v42, %v49_v40  ;;  %v181_v52 = vmax.f32 %v173_v46, 0.0 }
  0xe6   :  { %v176_v43 = vpop.f32.mrf.mxu0 }
  0xe7   :  { %v177_v45 = vadd.f32 %v176_v43, %v45_v41  ;;  %v182_v50 = vmax.f32 %v175_v44, 0.0 }
  0xe8   :  { %v178_v47 = vpop.f32.mrf.mxu0 }
  0xe9   :  { %v179_v48 = vadd.f32 %v178_v47, %v49_v40  ;;  %v183_v49 = vmax.f32 %v177_v45, 0.0 }
  0xeb   :  { %v184_v51 = vmax.f32 %v179_v48, 0.0  ;;  %v185_v54 = vpack.c.bf16 %v183_v49, %v181_v52 }
  0xed   :  { %v186_v53 = vpack.c.bf16 %v184_v51, %v182_v50 }
  0xef   :  { %354 = vmatprep.mubr.bf16.mxu1 %v186_v53 }
  0xf0   :  { %355 = vmatmul.mubr.bf16.vlgmr.msra.gmra.mxu1 %v185_v54 }
 0x1b0   :  { %v431_v55 = vpop.f32.mrf.mxu1 }
 0x1b2   :  { %v432_v57 = vpop.f32.mrf.mxu1 }
 0x1b3   :  { %v433_v58 = vadd.f32 %v432_v57, %v431_v55 }
 0x1b4   :  { %v434_v59 = vpop.f32.mrf.mxu1 }
 0x1b5   :  { %v357_v60 = vadd.f32 %v433_v58, %v398_v56 }
 0x1b6   :  { %v435_v61 = vpop.f32.mrf.mxu1 }
 0x1b7   :  { %363 = vst [vmem:[#allocation2] sm:$0xff] %v357_v60  ;;  %v436_v62 = vadd.f32 %v435_v61, %v434_v59 }
 0x1b9   :  { %v360_v63 = vadd.f32 %v436_v62, %v398_v56 }
 0x1bb   :  { %364 = vst [vmem:[#allocation2 + $0x8] sm:$0xff] %v360_v63 }
 0x1bc   :  { %493 = shalt.err (!%p490_p4)
}
 0x1bd   :  { %s506_s4 = smov 128   ;;  %s507_s12 = smov 8  }
 0x1be   :  { %376 = dma.vmem_to_hbm [thread:$0]  %s371_s10, 256, %s651_s5, [#allocation3], %s506_s4, %s506_s4, %s507_s12  }
 0x1bf   :  { %502 = dma.done.wait [#allocation3], 256  }
 0x1c0   :  { %503 = vsyncadd [#allocation3], 4294967040 }
 0x1c1   :  { %380 = vsyncpa [#allocation3], 1 }

</bundles_post_ra>
